<compile_context>
chip_gen: v5e
topology: v5e:2x2
jax: 0.10.0
libtpu: 0.0.40
codegen_flags: <defaults>
</compile_context>

<pallas_src>
import functools

import jax
import jax.numpy as jnp
from jax.experimental import pallas as pl
from jax.experimental.pallas import tpu as pltpu


def _moving_avg_kernel(x_ref, out_ref, xp_ref, *, kernel_size, stride, pad,
                       delta, seq_len, tile_rows):
    """Grid = (lane tiles, L_out tiles); t = L_out-tile index (innermost).

    x_ref  : (L, tn)          current lane-tile of the (L, B*C) input (VMEM)
    out_ref: (tile_rows, tn)  output rows [t*tile_rows, t*tile_rows+tile_rows)
    xp_ref : (rows, tn)       persistent VMEM scratch with the replicate-padded
                              sequence: scratch row (delta + pad + i) == x[i],
                              rows below hold x[0], rows above hold x[L-1].
    """
    t = pl.program_id(1)
    lanes = out_ref.shape[1]
    head = delta + pad                       # static, multiple of 8
    tail = xp_ref.shape[0] - head - seq_len  # static, >= 0

    @pl.when(t == 0)
    def _fill_padded_scratch():
        # Body of the sequence: one aligned VMEM->VMEM DMA (no vreg traffic).
        pltpu.sync_copy(x_ref, xp_ref.at[pl.ds(head, seq_len), :])
        # Replicated edges (fused padding).
        if head > 0:
            xp_ref[pl.ds(0, head), :] = jnp.broadcast_to(
                x_ref[0:1, :], (head, lanes))
        if tail > 0:
            xp_ref[pl.ds(head + seq_len, tail), :] = jnp.broadcast_to(
                x_ref[seq_len - 1:seq_len, :], (tail, lanes))

    # out[r] = (1/K) * sum_k xp[r*stride + k]; padded row i lives at delta + i.
    base = t * (tile_rows * stride) + delta
    acc = jnp.zeros((tile_rows, lanes), jnp.float32)
    for k in range(kernel_size):
        if stride == 1:
            win = xp_ref[pl.ds(base + k, tile_rows), :]
        else:
            # Strided read straight from the VMEM ref (no full-tile materialize).
            win = xp_ref[pl.ds(base + k, tile_rows, stride=stride), :]
        acc = acc + win.astype(jnp.float32)
    out_ref[...] = (acc * (1.0 / kernel_size)).astype(out_ref.dtype)


_ACC_ELEMS = 16 * 1024  # ~64 KiB f32 accumulator per output tile (16 vregs)


def _pick_lane_tile(n):
    for cand in (1024, 512, 256, 128):
        if n % cand == 0:
            return cand
    return n  # full extent (allowed: block dim equals the array dim)


def moving_avg(x, kernel_size, stride):
    """Pallas TPU implementation of DLinear moving_avg.forward; x: (B, L, C)."""
    B, L, C = x.shape
    pad = (kernel_size - 1) // 2
    Lp = L + 2 * pad
    L_out = (Lp - kernel_size) // stride + 1
    assert L_out >= 1

    # Lane-dense re-layout: sequence on sublanes, batch*channels on lanes.
    N = B * C
    xt = jnp.transpose(x, (1, 0, 2)).reshape(L, N)

    tn = _pick_lane_tile(N)
    n_lane = N // tn
    max_rows = max(8, (_ACC_ELEMS // max(tn, 1)) // 8 * 8)
    if L_out <= max_rows:
        tile_rows, n_seq = L_out, 1
    else:
        tile_rows, n_seq = max_rows, pl.cdiv(L_out, max_rows)

    # Padded-sequence scratch: `delta` leading filler rows make the body copy
    # destination sublane-aligned; sized so the last (possibly overhanging)
    # output tile still reads in-bounds (overhang rows are masked on store).
    delta = (-pad) % 8
    needed = (n_seq * tile_rows - 1) * stride + kernel_size
    scratch_rows = delta + max(Lp, needed)

    kernel = functools.partial(
        _moving_avg_kernel, kernel_size=kernel_size, stride=stride, pad=pad,
        delta=delta, seq_len=L, tile_rows=tile_rows)

    out2d = pl.pallas_call(
        kernel,
        out_shape=jax.ShapeDtypeStruct((L_out, N), x.dtype),
        grid=(n_lane, n_seq),
        # Input block is constant along the L_out-tile axis -> fetched from HBM
        # once per lane tile and kept resident in VMEM.
        in_specs=[pl.BlockSpec((L, tn), lambda j, t: (0, j))],
        out_specs=pl.BlockSpec((tile_rows, tn), lambda j, t: (t, j)),
        scratch_shapes=[pltpu.VMEM((scratch_rows, tn), x.dtype)],
        compiler_params=pltpu.CompilerParams(
            dimension_semantics=("parallel", "arbitrary")),
    )(xt)

    return jnp.transpose(out2d.reshape(L_out, B, C), (1, 0, 2))


def moving_avg_ref(x, kernel_size, stride):
    """Pure-JAX reference matching the PyTorch module exactly."""
    B, L, C = x.shape
    pad = (kernel_size - 1) // 2
    front = jnp.repeat(x[:, :1, :], pad, axis=1)
    end = jnp.repeat(x[:, -1:, :], pad, axis=1)
    xp = jnp.concatenate([front, x, end], axis=1).astype(jnp.float32)
    Lp = L + 2 * pad
    L_out = (Lp - kernel_size) // stride + 1
    acc = jnp.zeros((B, L_out, C), jnp.float32)
    for k in range(kernel_size):
        lim = k + (L_out - 1) * stride + 1
        acc = acc + jax.lax.slice(xp, (0, k, 0), (B, lim, C), (1, stride, 1))
    return (acc * (1.0 / kernel_size)).astype(x.dtype)


if __name__ == "__main__":
    # Small deterministic example consistent with DLinear usage (stride=1,
    # kernel_size=25).  B*C = 128 -> full 128-lane vregs; two L_out tiles so
    # the persistent padded scratch is exercised across grid steps.
    B, L, C = 2, 256, 64
    kernel_size, stride = 25, 1

    key = jax.random.PRNGKey(0)
    x = jax.random.normal(key, (B, L, C), dtype=jnp.float32)

    out = jax.block_until_ready(moving_avg(x, kernel_size, stride))

    ref = moving_avg_ref(x, kernel_size, stride)
    assert out.shape == ref.shape == (B, L, C), (out.shape, ref.shape)
    assert jnp.allclose(out, ref, atol=1e-5, rtol=1e-5), float(
        jnp.max(jnp.abs(out - ref)))

    print("KERNEL_OK")
</pallas_src>

<mosaic_0001>
module attributes {stable_mosaic.version = 11 : i64} {
  func.func @_moving_avg_kernel(%arg0: i32, %arg1: i32, %arg2: memref<256x128xf32, #tpu.memory_space<vmem>>, %arg3: memref<128x128xf32, #tpu.memory_space<vmem>>, %arg4: memref<284x128xf32, #tpu.memory_space<vmem>>) attributes {dimension_semantics = [#tpu.dimension_semantics<parallel>, #tpu.dimension_semantics<arbitrary>], iteration_bounds = array<i64: 1, 2>, scalar_prefetch = 0 : i64, scratch_operands = 1 : i64, tpu.core_type = #tpu.core_type<tc>, window_params = [{transform_indices = @transform_0, window_bounds = array<i64: 256, 128>}, {transform_indices = @transform_1, window_bounds = array<i64: 128, 128>}]} {
    %c0_i32 = arith.constant 0 : i32
    %0 = arith.cmpi eq, %arg1, %c0_i32 : i32
    %1 = arith.extui %0 : i1 to i32
    %c0_i32_0 = arith.constant 0 : i32
    %2 = arith.cmpi ne, %1, %c0_i32_0 : i32
    scf.if %2 {
      "tpu.region"() ({
        %117 = tpu.sem_alloc : memref<!tpu.dma_semaphore, #tpu.memory_space<semaphore_mem>>
        %c16_i32_36 = arith.constant 16 : i32
        %c0_i32_37 = arith.constant 0 : i32
        %118 = tpu.memref_slice %arg4[%c16_i32_36, %c0_i32_37] : memref<284x128xf32, #tpu.memory_space<vmem>> -> memref<256x128xf32, #tpu.memory_space<vmem>>
        tpu.enqueue_dma source(%arg2 : memref<256x128xf32, #tpu.memory_space<vmem>>) target(%118 : memref<256x128xf32, #tpu.memory_space<vmem>>) target_semaphore(%117 : memref<!tpu.dma_semaphore, #tpu.memory_space<semaphore_mem>>)
        %c16_i32_38 = arith.constant 16 : i32
        %c0_i32_39 = arith.constant 0 : i32
        %119 = tpu.memref_slice %arg4[%c16_i32_38, %c0_i32_39] : memref<284x128xf32, #tpu.memory_space<vmem>> -> memref<256x128xf32, #tpu.memory_space<vmem>>
        tpu.wait_dma2 semaphore(%117 : memref<!tpu.dma_semaphore, #tpu.memory_space<semaphore_mem>>) src(%arg2 : memref<256x128xf32, #tpu.memory_space<vmem>>) dst(%119 : memref<256x128xf32, #tpu.memory_space<vmem>>)
        tpu.yield
      }) : () -> ()
      %c0_30 = arith.constant 0 : index
      %c0_31 = arith.constant 0 : index
      %109 = vector.load %arg2[%c0_30, %c0_31] : memref<256x128xf32, #tpu.memory_space<vmem>>, vector<1x128xf32>
      %110 = vector.shape_cast %109 : vector<1x128xf32> to vector<1x128xf32>
      %111 = vector.broadcast %110 : vector<1x128xf32> to vector<16x128xf32>
      %c0_32 = arith.constant 0 : index
      %c0_33 = arith.constant 0 : index
      %112 = vector.load %arg4[%c0_32, %c0_33] : memref<284x128xf32, #tpu.memory_space<vmem>>, vector<16x128xf32>
      tpu.vector_store %arg4[%c0_32, %c0_33], %111 {strides = array<i32>} : memref<284x128xf32, #tpu.memory_space<vmem>>, vector<16x128xf32>,
      %c255 = arith.constant 255 : index
      %c0_34 = arith.constant 0 : index
      %113 = vector.load %arg2[%c255, %c0_34] : memref<256x128xf32, #tpu.memory_space<vmem>>, vector<1x128xf32>
      %114 = vector.shape_cast %113 : vector<1x128xf32> to vector<1x128xf32>
      %115 = vector.broadcast %114 : vector<1x128xf32> to vector<12x128xf32>
      %c272 = arith.constant 272 : index
      %c0_35 = arith.constant 0 : index
      %116 = vector.load %arg4[%c272, %c0_35] : memref<284x128xf32, #tpu.memory_space<vmem>>, vector<12x128xf32>
      tpu.vector_store %arg4[%c272, %c0_35], %115 {strides = array<i32>} : memref<284x128xf32, #tpu.memory_space<vmem>>, vector<12x128xf32>,
    } else {
    }
    %c128_i32 = arith.constant 128 : i32
    %3 = arith.muli %arg1, %c128_i32 : i32
    %c4_i32 = arith.constant 4 : i32
    %4 = arith.addi %3, %c4_i32 : i32
    %cst = arith.constant 0.000000e+00 : f32
    %5 = vector.broadcast %cst : f32 to vector<128x128xf32>
    %c0_i32_1 = arith.constant 0 : i32
    %6 = arith.addi %4, %c0_i32_1 : i32
    %7 = arith.index_cast %6 : i32 to index
    %c0 = arith.constant 0 : index
    %8 = vector.load %arg4[%7, %c0] : memref<284x128xf32, #tpu.memory_space<vmem>>, vector<128x128xf32>
    %9 = arith.addf %5, %8 : vector<128x128xf32>
    %c1_i32 = arith.constant 1 : i32
    %10 = arith.addi %4, %c1_i32 : i32
    %11 = arith.index_cast %10 : i32 to index
    %c0_2 = arith.constant 0 : index
    %12 = vector.load %arg4[%11, %c0_2] : memref<284x128xf32, #tpu.memory_space<vmem>>, vector<128x128xf32>
    %13 = arith.addf %9, %12 : vector<128x128xf32>
    %c2_i32 = arith.constant 2 : i32
    %14 = arith.addi %4, %c2_i32 : i32
    %15 = arith.index_cast %14 : i32 to index
    %c0_3 = arith.constant 0 : index
    %16 = vector.load %arg4[%15, %c0_3] : memref<284x128xf32, #tpu.memory_space<vmem>>, vector<128x128xf32>
    %17 = arith.addf %13, %16 : vector<128x128xf32>
    %c3_i32 = arith.constant 3 : i32
    %18 = arith.addi %4, %c3_i32 : i32
    %19 = arith.index_cast %18 : i32 to index
    %c0_4 = arith.constant 0 : index
    %20 = vector.load %arg4[%19, %c0_4] : memref<284x128xf32, #tpu.memory_space<vmem>>, vector<128x128xf32>
    %21 = arith.addf %17, %20 : vector<128x128xf32>
    %c4_i32_5 = arith.constant 4 : i32
    %22 = arith.addi %4, %c4_i32_5 : i32
    %23 = arith.index_cast %22 : i32 to index
    %c0_6 = arith.constant 0 : index
    %24 = vector.load %arg4[%23, %c0_6] : memref<284x128xf32, #tpu.memory_space<vmem>>, vector<128x128xf32>
    %25 = arith.addf %21, %24 : vector<128x128xf32>
    %c5_i32 = arith.constant 5 : i32
    %26 = arith.addi %4, %c5_i32 : i32
    %27 = arith.index_cast %26 : i32 to index
    %c0_7 = arith.constant 0 : index
    %28 = vector.load %arg4[%27, %c0_7] : memref<284x128xf32, #tpu.memory_space<vmem>>, vector<128x128xf32>
    %29 = arith.addf %25, %28 : vector<128x128xf32>
    %c6_i32 = arith.constant 6 : i32
    %30 = arith.addi %4, %c6_i32 : i32
    %31 = arith.index_cast %30 : i32 to index
    %c0_8 = arith.constant 0 : index
    %32 = vector.load %arg4[%31, %c0_8] : memref<284x128xf32, #tpu.memory_space<vmem>>, vector<128x128xf32>
    %33 = arith.addf %29, %32 : vector<128x128xf32>
    %c7_i32 = arith.constant 7 : i32
    %34 = arith.addi %4, %c7_i32 : i32
    %35 = arith.index_cast %34 : i32 to index
    %c0_9 = arith.constant 0 : index
    %36 = vector.load %arg4[%35, %c0_9] : memref<284x128xf32, #tpu.memory_space<vmem>>, vector<128x128xf32>
    %37 = arith.addf %33, %36 : vector<128x128xf32>
    %c8_i32 = arith.constant 8 : i32
    %38 = arith.addi %4, %c8_i32 : i32
    %39 = arith.index_cast %38 : i32 to index
    %c0_10 = arith.constant 0 : index
    %40 = vector.load %arg4[%39, %c0_10] : memref<284x128xf32, #tpu.memory_space<vmem>>, vector<128x128xf32>
    %41 = arith.addf %37, %40 : vector<128x128xf32>
    %c9_i32 = arith.constant 9 : i32
    %42 = arith.addi %4, %c9_i32 : i32
    %43 = arith.index_cast %42 : i32 to index
    %c0_11 = arith.constant 0 : index
    %44 = vector.load %arg4[%43, %c0_11] : memref<284x128xf32, #tpu.memory_space<vmem>>, vector<128x128xf32>
    %45 = arith.addf %41, %44 : vector<128x128xf32>
    %c10_i32 = arith.constant 10 : i32
    %46 = arith.addi %4, %c10_i32 : i32
    %47 = arith.index_cast %46 : i32 to index
    %c0_12 = arith.constant 0 : index
    %48 = vector.load %arg4[%47, %c0_12] : memref<284x128xf32, #tpu.memory_space<vmem>>, vector<128x128xf32>
    %49 = arith.addf %45, %48 : vector<128x128xf32>
    %c11_i32 = arith.constant 11 : i32
    %50 = arith.addi %4, %c11_i32 : i32
    %51 = arith.index_cast %50 : i32 to index
    %c0_13 = arith.constant 0 : index
    %52 = vector.load %arg4[%51, %c0_13] : memref<284x128xf32, #tpu.memory_space<vmem>>, vector<128x128xf32>
    %53 = arith.addf %49, %52 : vector<128x128xf32>
    %c12_i32 = arith.constant 12 : i32
    %54 = arith.addi %4, %c12_i32 : i32
    %55 = arith.index_cast %54 : i32 to index
    %c0_14 = arith.constant 0 : index
    %56 = vector.load %arg4[%55, %c0_14] : memref<284x128xf32, #tpu.memory_space<vmem>>, vector<128x128xf32>
    %57 = arith.addf %53, %56 : vector<128x128xf32>
    %c13_i32 = arith.constant 13 : i32
    %58 = arith.addi %4, %c13_i32 : i32
    %59 = arith.index_cast %58 : i32 to index
    %c0_15 = arith.constant 0 : index
    %60 = vector.load %arg4[%59, %c0_15] : memref<284x128xf32, #tpu.memory_space<vmem>>, vector<128x128xf32>
    %61 = arith.addf %57, %60 : vector<128x128xf32>
    %c14_i32 = arith.constant 14 : i32
    %62 = arith.addi %4, %c14_i32 : i32
    %63 = arith.index_cast %62 : i32 to index
    %c0_16 = arith.constant 0 : index
    %64 = vector.load %arg4[%63, %c0_16] : memref<284x128xf32, #tpu.memory_space<vmem>>, vector<128x128xf32>
    %65 = arith.addf %61, %64 : vector<128x128xf32>
    %c15_i32 = arith.constant 15 : i32
    %66 = arith.addi %4, %c15_i32 : i32
    %67 = arith.index_cast %66 : i32 to index
    %c0_17 = arith.constant 0 : index
    %68 = vector.load %arg4[%67, %c0_17] : memref<284x128xf32, #tpu.memory_space<vmem>>, vector<128x128xf32>
    %69 = arith.addf %65, %68 : vector<128x128xf32>
    %c16_i32 = arith.constant 16 : i32
    %70 = arith.addi %4, %c16_i32 : i32
    %71 = arith.index_cast %70 : i32 to index
    %c0_18 = arith.constant 0 : index
    %72 = vector.load %arg4[%71, %c0_18] : memref<284x128xf32, #tpu.memory_space<vmem>>, vector<128x128xf32>
    %73 = arith.addf %69, %72 : vector<128x128xf32>
    %c17_i32 = arith.constant 17 : i32
    %74 = arith.addi %4, %c17_i32 : i32
    %75 = arith.index_cast %74 : i32 to index
    %c0_19 = arith.constant 0 : index
    %76 = vector.load %arg4[%75, %c0_19] : memref<284x128xf32, #tpu.memory_space<vmem>>, vector<128x128xf32>
    %77 = arith.addf %73, %76 : vector<128x128xf32>
    %c18_i32 = arith.constant 18 : i32
    %78 = arith.addi %4, %c18_i32 : i32
    %79 = arith.index_cast %78 : i32 to index
    %c0_20 = arith.constant 0 : index
    %80 = vector.load %arg4[%79, %c0_20] : memref<284x128xf32, #tpu.memory_space<vmem>>, vector<128x128xf32>
    %81 = arith.addf %77, %80 : vector<128x128xf32>
    %c19_i32 = arith.constant 19 : i32
    %82 = arith.addi %4, %c19_i32 : i32
    %83 = arith.index_cast %82 : i32 to index
    %c0_21 = arith.constant 0 : index
    %84 = vector.load %arg4[%83, %c0_21] : memref<284x128xf32, #tpu.memory_space<vmem>>, vector<128x128xf32>
    %85 = arith.addf %81, %84 : vector<128x128xf32>
    %c20_i32 = arith.constant 20 : i32
    %86 = arith.addi %4, %c20_i32 : i32
    %87 = arith.index_cast %86 : i32 to index
    %c0_22 = arith.constant 0 : index
    %88 = vector.load %arg4[%87, %c0_22] : memref<284x128xf32, #tpu.memory_space<vmem>>, vector<128x128xf32>
    %89 = arith.addf %85, %88 : vector<128x128xf32>
    %c21_i32 = arith.constant 21 : i32
    %90 = arith.addi %4, %c21_i32 : i32
    %91 = arith.index_cast %90 : i32 to index
    %c0_23 = arith.constant 0 : index
    %92 = vector.load %arg4[%91, %c0_23] : memref<284x128xf32, #tpu.memory_space<vmem>>, vector<128x128xf32>
    %93 = arith.addf %89, %92 : vector<128x128xf32>
    %c22_i32 = arith.constant 22 : i32
    %94 = arith.addi %4, %c22_i32 : i32
    %95 = arith.index_cast %94 : i32 to index
    %c0_24 = arith.constant 0 : index
    %96 = vector.load %arg4[%95, %c0_24] : memref<284x128xf32, #tpu.memory_space<vmem>>, vector<128x128xf32>
    %97 = arith.addf %93, %96 : vector<128x128xf32>
    %c23_i32 = arith.constant 23 : i32
    %98 = arith.addi %4, %c23_i32 : i32
    %99 = arith.index_cast %98 : i32 to index
    %c0_25 = arith.constant 0 : index
    %100 = vector.load %arg4[%99, %c0_25] : memref<284x128xf32, #tpu.memory_space<vmem>>, vector<128x128xf32>
    %101 = arith.addf %97, %100 : vector<128x128xf32>
    %c24_i32 = arith.constant 24 : i32
    %102 = arith.addi %4, %c24_i32 : i32
    %103 = arith.index_cast %102 : i32 to index
    %c0_26 = arith.constant 0 : index
    %104 = vector.load %arg4[%103, %c0_26] : memref<284x128xf32, #tpu.memory_space<vmem>>, vector<128x128xf32>
    %105 = arith.addf %101, %104 : vector<128x128xf32>
    %cst_27 = arith.constant 4.000000e-02 : f32
    %106 = vector.broadcast %cst_27 : f32 to vector<128x128xf32>
    %107 = arith.mulf %105, %106 : vector<128x128xf32>
    %c0_28 = arith.constant 0 : index
    %c0_29 = arith.constant 0 : index
    %108 = vector.load %arg3[%c0_28, %c0_29] : memref<128x128xf32, #tpu.memory_space<vmem>>, vector<128x128xf32>
    tpu.vector_store %arg3[%c0_28, %c0_29], %107 {strides = array<i32>} : memref<128x128xf32, #tpu.memory_space<vmem>>, vector<128x128xf32>,
    return
  }
  func.func @transform_0(%arg0: i32, %arg1: i32) -> (i32, i32) {
    %c0_i32 = arith.constant 0 : i32
    %c0_i32_0 = arith.constant 0 : i32
    return %c0_i32, %arg0 : i32, i32
  }
  func.func @transform_1(%arg0: i32, %arg1: i32) -> (i32, i32) {
    %c0_i32 = arith.constant 0 : i32
    return %arg1, %arg0 : i32, i32
  }
}

</mosaic_0001>

<bundles_post_ra>
// kernel: tpu_custom_call.1
= control target key start
LH: loop header
LB: loop body
LE: loop exit
PB: predicated region body
PF: predicated region fallthrough
CT: control target
= control target key end

     0   :  { %6 = vsyncpa [#allocation4], 0  ;;  %s2817_s0 = inlined_call_operand.hbm [shape: f32[256,128], index: 0, kind: input, shape index: {}]   ;;  %s2818_s1 = inlined_call_operand.hbm [shape: f32[256,128], index: 1, kind: output, shape index: {}]  }
   0x1   :  { %7 = vsyncpa [#allocation5], 0 }
   0x2   :  { %9 = vsyncpa [#allocation5 + $0x1], 0  ;;  %s1925_s6 = smov 0   ;;  %s1927_s7 = smov 0  }
   0x3   :  { %s1929_s8 = smov 0   ;;  %s1931_s9 = smov 0  }
   0x4   :  { %s1933_s10 = smov 0   ;;  %s1935_s11 = smov 0  }
   0x5 LB: > { %s1283_s12 = sadd.s32 4294967295, %s1908_s11   ;;  %s1284_s13 = sadd.s32 4294967294, %s1908_s11   ;;  %s1908_s11 = sphi %s1935_s11, %s15_s11   ;;  %s1904_s10 = sphi %s1933_s10, %s2841_s10   ;;  %s1900_s9 = sphi %s1931_s9, %s2840_s9   ;;  %s1896_s8 = sphi %s1929_s8, %s2839_s8   ;;  %s1892_s7 = sphi %s1927_s7, %s2838_s7   ;;  %s1888_s6 = sphi %s1925_s6, %s2837_s6  }
   0x6   : > { %s24_s14 = sadd.s32 1, %s1904_s10  ;;  %s62_s15 = sadd.s32 1, %s1896_s8 }
   0x7   : > { %p25_p0 = scmp.ge.s32.totalorder %s24_s14, 2  ;;  %p72_p1 = scmp.ne.s32.totalorder %s1896_s8, %s1892_s7 }
   0x8   : > { %p73_p2 = scmp.eq.s32.totalorder %s1283_s12, 1  ;;  %p78_p3 = scmp.ne.s32.totalorder %s1892_s7, %s1888_s6 }
   0x9   : > { %s2843_s14 = smov (%p25_p0, %s24_s14), 0  ;;  %p79_p5 = scmp.eq.s32.totalorder %s1284_s13, 1 }
   0xa   : > { %p1965_p4 = por %p73_p2, %p72_p1  ;;  %s57_s17 = ssub.s32 %s1904_s10, %s2843_s14 }
   0xb   : > { %p1285_p6 = scmp.ge.s32.totalorder %s1908_s11, 1  ;;  %p60_p7 = scmp.eq.s32.totalorder %s57_s17, 0 }
   0xc   : > { %p1972_p8 = por %p79_p5, %p78_p3  ;;  %p86_p9 = scmp.lt.s32.totalorder %s1908_s11, 3 }
   0xd   : > { %s1978_s19 = scalar_select %p60_p7, %s1896_s8, %s62_s15  }
   0xe   : > { %p87_p10 = pnand %p1285_p6, %p86_p9  ;;  %p1736_p11 = scmp.eq.s32.totalorder %s1283_s12, 0 }
   0xf   : > { %s99_s22 = sshll.u32 %s2817_s0, 4  ;;  %s1910_s23 = smov [#allocation3]   ;;  %s100_s22 = int_to_ptr.hbm [resolvable:$true] %s99_s22 }
  0x10   : > { %p1728_p12 = pneg %p87_p10  ;;  %s101_s24 = sshll.u32 %s1910_s23, 4  ;;  %s102_s24 = int_to_ptr.vmem [resolvable:$true] %s101_s24 }
  0x11   : > { %s1911_s25 = smov 128   ;;  %s1912_s26 = smov 8  }
  0x12   : > { %p1729_p13 = pnand %p1736_p11, %p1728_p12  ;;  %117 = sbr.rel (%p87_p10) target bundleno = 202 (0xca), region = 24 }
  0x14   : > { %1731 = dma.hbm_to_vmem [thread:$0]  (!%p1729_p13), %s100_s22, 4096, %s102_s24, [#allocation4], %s1911_s25, %s1911_s25, %s1912_s26  }
  0x17   : > { %1877 = dma.done.wait (%p1736_p11), [#allocation4], 4096  }
  0x18   : > { %1879 = vsyncadd (%p1736_p11), [#allocation4], 4294963200  ;;  %s130_s27 = sand.u32 1, %s1892_s7   ;;  %p1290_p0 = scmp.ne.s32.totalorder %s1900_s9, 0 }
  0x19   : > { %s1289_s28 = sshll.u32 %s130_s27, 7 }
  0x1a   : > { %s1986_s29 = scalar_lea.vmem [#allocation6], %s1289_s28  ;;  %137 = sbr.rel (%p1290_p0) target bundleno = 71 (0x47), region = 32 }
  0x1f   : > { %v149_v0 = vld [vmem:[#allocation3] sm:$0xff]  ;;  %v151_v1 = vld [vmem:[#allocation3 + $0x8] sm:$0xff]  ;;  %v153_v2 = vld [vmem:[#allocation3 + $0x10] sm:$0xff] }
  0x20   : > { %150 = vst [vmem:[#allocation2 + $0x10] sm:$0xff] %v149_v0  ;;  %v155_v3 = vld [vmem:[#allocation3 + $0x18] sm:$0xff]  ;;  %v157_v4 = vld [vmem:[#allocation3 + $0x20] sm:$0xff]  ;;  %v159_v5 = vld [vmem:[#allocation3 + $0x28] sm:$0xff] }
  0x21   : > { %152 = vst [vmem:[#allocation2 + $0x18] sm:$0xff] %v151_v1  ;;  %v161_v6 = vld [vmem:[#allocation3 + $0x30] sm:$0xff]  ;;  %v163_v7 = vld [vmem:[#allocation3 + $0x38] sm:$0xff]  ;;  %v165_v8 = vld [vmem:[#allocation3 + $0x40] sm:$0xff] }
  0x22   : > { %154 = vst [vmem:[#allocation2 + $0x20] sm:$0xff] %v153_v2  ;;  %v167_v9 = vld [vmem:[#allocation3 + $0x48] sm:$0xff]  ;;  %v169_v10 = vld [vmem:[#allocation3 + $0x50] sm:$0xff]  ;;  %v171_v11 = vld [vmem:[#allocation3 + $0x58] sm:$0xff] }
  0x23   : > { %156 = vst [vmem:[#allocation2 + $0x28] sm:$0xff] %v155_v3  ;;  %v173_v12 = vld [vmem:[#allocation3 + $0x60] sm:$0xff]  ;;  %v175_v13 = vld [vmem:[#allocation3 + $0x68] sm:$0xff]  ;;  %v177_v14 = vld [vmem:[#allocation3 + $0x70] sm:$0xff] }
  0x24   : > { %158 = vst [vmem:[#allocation2 + $0x30] sm:$0xff] %v157_v4  ;;  %v179_v15 = vld [vmem:[#allocation3 + $0x78] sm:$0xff]  ;;  %v181_v16 = vld [vmem:[#allocation3 + $0x80] sm:$0xff]  ;;  %v183_v17 = vld [vmem:[#allocation3 + $0x88] sm:$0xff] }
  0x25   : > { %160 = vst [vmem:[#allocation2 + $0x38] sm:$0xff] %v159_v5  ;;  %v185_v18 = vld [vmem:[#allocation3 + $0x90] sm:$0xff]  ;;  %v187_v19 = vld [vmem:[#allocation3 + $0x98] sm:$0xff]  ;;  %v189_v20 = vld [vmem:[#allocation3 + $0xa0] sm:$0xff] }
  0x26   : > { %162 = vst [vmem:[#allocation2 + $0x40] sm:$0xff] %v161_v6  ;;  %v191_v21 = vld [vmem:[#allocation3 + $0xa8] sm:$0xff]  ;;  %v193_v22 = vld [vmem:[#allocation3 + $0xb0] sm:$0xff]  ;;  %v195_v23 = vld [vmem:[#allocation3 + $0xb8] sm:$0xff] }
  0x27   : > { %164 = vst [vmem:[#allocation2 + $0x48] sm:$0xff] %v163_v7  ;;  %v197_v24 = vld [vmem:[#allocation3 + $0xc0] sm:$0xff]  ;;  %v199_v25 = vld [vmem:[#allocation3 + $0xc8] sm:$0xff]  ;;  %v201_v26 = vld [vmem:[#allocation3 + $0xd0] sm:$0xff] }
  0x28   : > { %166 = vst [vmem:[#allocation2 + $0x50] sm:$0xff] %v165_v8  ;;  %v203_v27 = vld [vmem:[#allocation3 + $0xd8] sm:$0xff]  ;;  %v205_v28 = vld [vmem:[#allocation3 + $0xe0] sm:$0xff]  ;;  %v207_v29 = vld [vmem:[#allocation3 + $0xe8] sm:$0xff] }
  0x29   : > { %168 = vst [vmem:[#allocation2 + $0x58] sm:$0xff] %v167_v9  ;;  %v209_v30 = vld [vmem:[#allocation3 + $0xf0] sm:$0xff]  ;;  %v211_v31 = vld [vmem:[#allocation3 + $0xf8] sm:$0xff] }
  0x2a   : > { %170 = vst [vmem:[#allocation2 + $0x60] sm:$0xff] %v169_v10 }
  0x2b   : > { %172 = vst [vmem:[#allocation2 + $0x68] sm:$0xff] %v171_v11 }
  0x2c   : > { %174 = vst [vmem:[#allocation2 + $0x70] sm:$0xff] %v173_v12 }
  0x2d   : > { %176 = vst [vmem:[#allocation2 + $0x78] sm:$0xff] %v175_v13 }
  0x2e   : > { %178 = vst [vmem:[#allocation2 + $0x80] sm:$0xff] %v177_v14 }
  0x2f   : > { %180 = vst [vmem:[#allocation2 + $0x88] sm:$0xff] %v179_v15 }
  0x30   : > { %182 = vst [vmem:[#allocation2 + $0x90] sm:$0xff] %v181_v16 }
  0x31   : > { %184 = vst [vmem:[#allocation2 + $0x98] sm:$0xff] %v183_v17 }
  0x32   : > { %186 = vst [vmem:[#allocation2 + $0xa0] sm:$0xff] %v185_v18 }
  0x33   : > { %188 = vst [vmem:[#allocation2 + $0xa8] sm:$0xff] %v187_v19 }
  0x34   : > { %190 = vst [vmem:[#allocation2 + $0xb0] sm:$0xff] %v189_v20 }
  0x35   : > { %192 = vst [vmem:[#allocation2 + $0xb8] sm:$0xff] %v191_v21 }
  0x36   : > { %194 = vst [vmem:[#allocation2 + $0xc0] sm:$0xff] %v193_v22 }
  0x37   : > { %196 = vst [vmem:[#allocation2 + $0xc8] sm:$0xff] %v195_v23 }
  0x38   : > { %198 = vst [vmem:[#allocation2 + $0xd0] sm:$0xff] %v197_v24 }
  0x39   : > { %200 = vst [vmem:[#allocation2 + $0xd8] sm:$0xff] %v199_v25 }
  0x3a   : > { %202 = vst [vmem:[#allocation2 + $0xe0] sm:$0xff] %v201_v26 }
  0x3b   : > { %204 = vst [vmem:[#allocation2 + $0xe8] sm:$0xff] %v203_v27 }
  0x3c   : > { %206 = vst [vmem:[#allocation2 + $0xf0] sm:$0xff] %v205_v28 }
  0x3d   : > { %208 = vst [vmem:[#allocation2 + $0xf8] sm:$0xff] %v207_v29 }
  0x3e   : > { %210 = vst [vmem:[#allocation2 + $0x100] sm:$0xff] %v209_v30 }
  0x3f   : > { %212 = vst [vmem:[#allocation2 + $0x108] sm:$0xff] %v211_v31 }
  0x40   : > { %218 = vsyncadd [#allocation7], 4096 }
  0x41   : > { %1880 = dma.done.wait [#allocation7], 4096 }
  0x42   : > { %1881 = vsyncadd [#allocation7], 4294963200  ;;  %v1792_v32 = vld [vmem:[#allocation3] ss:$0 sm:$0xff]  ;;  %v1793_v33 = vld [vmem:[#allocation3 + $0xff] ss:$0 sm:$0xff] }
  0x43   : > { %224 = vst [vmem:[#allocation2] sm:$0xff] %v1792_v32 }
  0x44   : > { %225 = vst [vmem:[#allocation2 + $0x8] sm:$0xff] %v1792_v32 }
  0x45   : > { %228 = vst [vmem:[#allocation2 + $0x110] sm:$0xff] %v1793_v33 }
  0x46   : > { %229 = vst [vmem:[#allocation2 + $0x118] sm:$0xf] %v1793_v33 }
  0x47 PF: > { %s1291_s30 = sshll.u32 %s1900_s9, 7  ;;  %s1127_s12 = sshll.u32 %s1986_s29, 4  ;;  %s1128_s12 = int_to_ptr.vmem [resolvable:$true] %s1127_s12 }
  0x48   : > { %s1992_s2 = scalar_lea.vmem [#allocation2], %s1291_s30  ;;  %s1126_s5 = scalar_lea.hbm %s2818_s1, %s1291_s30 }
  0x49   : > { %s1129_s13 = sshll.u32 %s1126_s5, 4  ;;  %s1114_s9 = scalar_lea.sflag [#allocation5], %s130_s27  ;;  %s1130_s13 = int_to_ptr.hbm [resolvable:$true] %s1129_s13 }
  0x4a   : > { %s1838_s15 = sshra.s32 %s1130_s13, 4  ;;  %s1844_s22 = scalar_lea.hbm %s2818_s1, 256  ;;  %s1839_s15 = int_to_ptr.hbm [resolvable:$true] %s1838_s15 }
  0x4b   : > { %s1840_s17 = scalar_lea.hbm %s1839_s15, 128  ;;  %p1845_p5 = scmp.lt.s32.totalorder %s1839_s15, %s2818_s1 }
  0x4c   : > { %p1841_p1 = scmp.ne.s32.totalorder %s1839_s15, %s1840_s17  ;;  %p1846_p6 = scmp.lt.s32.totalorder %s1844_s22, %s1840_s17 }
  0x4d   : > { %v1292_v34 = vld [vmem:[%s1992_s2 + $0x4] sm:$0xff]  ;;  %v1428_v39 = vld [vmem:[%s1992_s2 + $0xc] sm:$0xff]  ;;  %v2011_v47 = vld [vmem:[%s1992_s2 + $0x14] sm:$0xff] }
  0x4e   : > { %v1309_v35 = vld [vmem:[%s1992_s2 + $0x5] sm:$0xff]  ;;  %v2000_v41 = vld [vmem:[%s1992_s2 + $0xd] sm:$0xff]  ;;  %v2014_v48 = vld [vmem:[%s1992_s2 + $0x15] sm:$0xff]  ;;  %p1842_p2 = pnand %p1841_p1, %p1965_p4  ;;  %p1847_p7 = por %p1846_p6, %p1845_p5 }
  0x4f   : > { %v1326_v36 = vld [vmem:[%s1992_s2 + $0x6] sm:$0xff]  ;;  %v283_v37 = vadd.f32 %v1309_v35, %v1292_v34  ;;  %v2003_v42 = vld [vmem:[%s1992_s2 + $0xe] sm:$0xff]  ;;  %v284_v44 = vadd.f32 %v2000_v41, %v1428_v39  ;;  %v2018_v50 = vld [vmem:[%s1992_s2 + $0x16] sm:$0xff]  ;;  %v285_v52 = vadd.f32 %v2014_v48, %v2011_v47 }
  0x50   : > { %v1343_v38 = vld [vmem:[%s1992_s2 + $0x7] sm:$0xff]  ;;  %v2008_v46 = vld [vmem:[%s1992_s2 + $0xf] sm:$0xff]  ;;  %v2028_v56 = vld [vmem:[%s1992_s2 + $0x17] sm:$0xff]  ;;  %p1843_p3 = pneg %p1842_p2 }
  0x51   : > { %v317_v40 = vadd.f32 %v1326_v36, %v283_v37  ;;  %v1360_v43 = vld [vmem:[%s1992_s2 + $0x8] sm:$0xff]  ;;  %v318_v51 = vadd.f32 %v2003_v42, %v284_v44  ;;  %v2025_v55 = vld [vmem:[%s1992_s2 + $0x10] sm:$0xff]  ;;  %v2031_v57 = vld [vmem:[%s1992_s2 + $0x1c] sm:$0xff]  ;;  %v319_v61 = vadd.f32 %v2018_v50, %v285_v52 }
  0x52   : > { %v1377_v49 = vld [vmem:[%s1992_s2 + $0x9] sm:$0xff]  ;;  %v2035_v59 = vld [vmem:[%s1992_s2 + $0x1d] sm:$0xff]  ;;  %v2043_v0 = vld [vmem:[%s1992_s2 + $0x11] sm:$0xff]  ;;  %p1848_p9 = pnand %p1847_p7, %p1843_p3 }
  0x53   : > { %v351_v45 = vadd.f32 %v1343_v38, %v317_v40  ;;  %v1394_v54 = vld [vmem:[%s1992_s2 + $0xa] sm:$0xff]  ;;  %v352_v58 = vadd.f32 %v2008_v46, %v318_v51  ;;  %v2038_v60 = vld [vmem:[%s1992_s2 + $0x1e] sm:$0xff]  ;;  %v286_v2 = vadd.f32 %v2031_v57, %v2035_v59  ;;  %v2051_v3 = vld [vmem:[%s1992_s2 + $0x12] sm:$0xff]  ;;  %v353_v7 = vadd.f32 %v2028_v56, %v319_v61 }
  0x54   : > { %v1411_v63 = vld [vmem:[%s1992_s2 + $0xb] sm:$0xff]  ;;  %v2046_v1 = vld [vmem:[%s1992_s2 + $0x18] sm:$0xff]  ;;  %v2079_v16 = vld [vmem:[%s1992_s2 + $0x20] sm:$0xff] }
  0x55   : > { %v385_v53 = vadd.f32 %v1360_v43, %v351_v45  ;;  %v386_v4 = vadd.f32 %v2025_v55, %v352_v58  ;;  %v2055_v5 = vld [vmem:[%s1992_s2 + $0x1f] sm:$0xff]  ;;  %v320_v12 = vadd.f32 %v2038_v60, %v286_v2  ;;  %v2072_v13 = vld [vmem:[%s1992_s2 + $0x13] sm:$0xff]  ;;  %v387_v17 = vadd.f32 %v2046_v1, %v353_v7  ;;  %v2085_v20 = vld [vmem:[%s1992_s2 + $0x27] sm:$0xff] }
  0x56   : > { %v2058_v6 = vld [vmem:[%s1992_s2 + $0x24] sm:$0xff]  ;;  %v2062_v9 = vld [vmem:[%s1992_s2 + $0x19] sm:$0xff]  ;;  %v2088_v21 = vld [vmem:[%s1992_s2 + $0x2c] sm:$0xff] }
  0x57   : > { %v419_v62 = vadd.f32 %v1377_v49, %v385_v53  ;;  %v2065_v10 = vld [vmem:[%s1992_s2 + $0x25] sm:$0xff]  ;;  %v2075_v14 = vld [vmem:[%s1992_s2 + $0x1a] sm:$0xff]  ;;  %v420_v15 = vadd.f32 %v2043_v0, %v386_v4  ;;  %v354_v22 = vadd.f32 %v2055_v5, %v320_v12  ;;  %v2092_v23 = vld [vmem:[%s1992_s2 + $0x2d] sm:$0xff]  ;;  %v421_v27 = vadd.f32 %v2062_v9, %v387_v17 }
  0x58   : > { %v2068_v11 = vld [vmem:[%s1992_s2 + $0x26] sm:$0xff]  ;;  %v287_v18 = vadd.f32 %v2058_v6, %v2065_v10  ;;  %v2095_v24 = vld [vmem:[%s1992_s2 + $0x1b] sm:$0xff]  ;;  %v2103_v28 = vld [vmem:[%s1992_s2 + $0x2e] sm:$0xff]  ;;  %v288_v30 = vadd.f32 %v2088_v21, %v2092_v23 }
  0x59   : > { %v453_v8 = vadd.f32 %v1394_v54, %v419_v62  ;;  %v454_v25 = vadd.f32 %v2051_v3, %v420_v15  ;;  %v2099_v26 = vld [vmem:[%s1992_s2 + $0x21] sm:$0xff]  ;;  %v388_v34 = vadd.f32 %v2079_v16, %v354_v22  ;;  %v2116_v35 = vld [vmem:[%s1992_s2 + $0x2f] sm:$0xff]  ;;  %v455_v37 = vadd.f32 %v2075_v14, %v421_v27  ;;  %v2148_v62 = vld [vmem:[%s1992_s2 + $0x37] sm:$0xff] }
  0x5a   : > { %v321_v29 = vadd.f32 %v2068_v11, %v287_v18  ;;  %v2109_v32 = vld [vmem:[%s1992_s2 + $0x22] sm:$0xff]  ;;  %v2121_v38 = vld [vmem:[%s1992_s2 + $0x34] sm:$0xff]  ;;  %v322_v44 = vadd.f32 %v2103_v28, %v288_v30  ;;  %v2156_v7 = vld [vmem:[%s1992_s2 + $0x2a] sm:$0xff] }
  0x5b   : > { %v487_v19 = vadd.f32 %v1411_v63, %v453_v8  ;;  %v2112_v33 = vld [vmem:[%s1992_s2 + $0x28] sm:$0xff]  ;;  %v488_v36 = vadd.f32 %v2072_v13, %v454_v25  ;;  %v2128_v43 = vld [vmem:[%s1992_s2 + $0x36] sm:$0xff]  ;;  %v422_v51 = vadd.f32 %v2099_v26, %v388_v34  ;;  %v489_v61 = vadd.f32 %v2095_v24, %v455_v37  ;;  %v2174_v27 = vld [vmem:[%s1992_s2 + $0x3e] sm:$0xff] }
  0x5c   : > { %v355_v40 = vadd.f32 %v2085_v20, %v321_v29  ;;  %v2133_v49 = vld [vmem:[%s1992_s2 + $0x29] sm:$0xff]  ;;  %v2151_v63 = vld [vmem:[%s1992_s2 + $0x3c] sm:$0xff]  ;;  %v356_v2 = vadd.f32 %v2116_v35, %v322_v44  ;;  %v2160_v12 = vld [vmem:[%s1992_s2 + $0x31] sm:$0xff] }
  0x5d   : > { %v521_v31 = vadd.f32 %v1428_v39, %v487_v19  ;;  %v2125_v39 = vld [vmem:[%s1992_s2 + $0x35] sm:$0xff]  ;;  %v522_v54 = vadd.f32 %v2011_v47, %v488_v36  ;;  %v2143_v58 = vld [vmem:[%s1992_s2 + $0x23] sm:$0xff]  ;;  %v456_v8 = vadd.f32 %v2109_v32, %v422_v51  ;;  %v523_v19 = vadd.f32 %v2031_v57, %v489_v61  ;;  %v2178_v30 = vld [vmem:[%s1992_s2 + $0x2b] sm:$0xff] }
  0x5e   : > { %v2137_v52 = vld [vmem:[%s1992_s2 + $0x30] sm:$0xff]  ;;  %v289_v53 = vadd.f32 %v2121_v38, %v2125_v39  ;;  %v2163_v15 = vld [vmem:[%s1992_s2 + $0x3d] sm:$0xff] }
  0x5f   : > { %v555_v45 = vadd.f32 %v2000_v41, %v521_v31  ;;  %v389_v41 = vadd.f32 %v2112_v33, %v355_v40  ;;  %v556_v18 = vadd.f32 %v2014_v48, %v522_v54  ;;  %v2170_v25 = vld [vmem:[%s1992_s2 + $0x38] sm:$0xff]  ;;  %v490_v31 = vadd.f32 %v2143_v58, %v456_v8 }
  0x60   : > { %v323_v17 = vadd.f32 %v2128_v43, %v289_v53  ;;  %v2182_v34 = vld [vmem:[%s1992_s2 + $0x32] sm:$0xff]  ;;  %v290_v37 = vadd.f32 %v2151_v63, %v2163_v15  ;;  %v557_v44 = vadd.f32 %v2035_v59, %v523_v19  ;;  %v2195_v53 = vld [vmem:[%s1992_s2 + $0x3f] sm:$0xff] }
  0x61   : > { %v589_v4 = vadd.f32 %v2003_v42, %v555_v45  ;;  %v423_v22 = vadd.f32 %v2133_v49, %v389_v41  ;;  %v390_v42 = vadd.f32 %v2137_v52, %v356_v2  ;;  %2829 = vst [vmem:[#allocation12_spill] sm:$0xff] %v2182_v34  ;;  %v590_v40 = vadd.f32 %v2018_v50, %v556_v18  ;;  %v2200_v41 = vld [vmem:[%s1992_s2 + $0x33] sm:$0xff] }
  0x62   : > { %v357_v36 = vadd.f32 %v2148_v62, %v323_v17  ;;  %v524_v61 = vadd.f32 %v2058_v6, %v490_v31  ;;  %2830 = vst [vmem:[#allocation13_spill] sm:$0xff] %v2200_v41  ;;  %v591_v17 = vadd.f32 %v2038_v60, %v557_v44  ;;  %v2208_v19 = vld [vmem:[%s1992_s2 + $0x3a] sm:$0xff] }
  0x63   : > { %v623_v29 = vadd.f32 %v2008_v46, %v589_v4  ;;  %v457_v45 = vadd.f32 %v2156_v7, %v423_v22  ;;  %v2191_v46 = vld [vmem:[%s1992_s2 + $0x39] sm:$0xff]  ;;  %v424_v51 = vadd.f32 %v2160_v12, %v390_v42  ;;  %v324_v4 = vadd.f32 %v2174_v27, %v290_v37 }
  0x64   : > { %v391_v2 = vadd.f32 %v2170_v25, %v357_v36  ;;  %v624_v8 = vadd.f32 %v2028_v56, %v590_v40  ;;  %v2212_v22 = vld [vmem:[%s1992_s2 + $0x40] sm:$0xff]  ;;  %v625_v40 = vadd.f32 %v2055_v5, %v591_v17 }
  0x65   : > { %v657_v54 = vadd.f32 %v2025_v55, %v623_v29  ;;  %v491_v18 = vadd.f32 %v2178_v30, %v457_v45  ;;  %v458_v55 = vadd.f32 %v2182_v34, %v424_v51  ;;  %v558_v29 = vadd.f32 %v2065_v10, %v524_v61  ;;  %v2222_v45 = vld [vmem:[%s1992_s2 + $0x3b] sm:$0xff] }
  0x66   : > { %v425_v31 = vadd.f32 %v2191_v46, %v391_v2  ;;  %v358_v36 = vadd.f32 %v2195_v53, %v324_v4  ;;  %v658_v37 = vadd.f32 %v2046_v1, %v624_v8  ;;  %v2226_v34 = vld [vmem:[%s1992_s2 + $0x41] sm:$0xff]  ;;  %v659_v8 = vadd.f32 %v2079_v16, %v625_v40 }
  0x67   : > { %v691_v42 = vadd.f32 %v2043_v0, %v657_v54  ;;  %v525_v44 = vadd.f32 %v2088_v21, %v491_v18  ;;  %v492_v51 = vadd.f32 %v2200_v41, %v458_v55  ;;  %v592_v54 = vadd.f32 %v2068_v11, %v558_v29  ;;  %v2237_v55 = vld [vmem:[%s1992_s2 + $0x42] sm:$0xff] }
  0x68   : > { %v459_v61 = vadd.f32 %v2208_v19, %v425_v31  ;;  %v392_v2 = vadd.f32 %v2212_v22, %v358_v36  ;;  %v692_v4 = vadd.f32 %v2062_v9, %v658_v37  ;;  %v693_v36 = vadd.f32 %v2099_v26, %v659_v8 }
  0x69   : > { %v725_v0 = vadd.f32 %v2051_v3, %v691_v42  ;;  %v559_v17 = vadd.f32 %v2092_v23, %v525_v44  ;;  %v526_v18 = vadd.f32 %v2121_v38, %v492_v51  ;;  %v626_v3 = vadd.f32 %v2085_v20, %v592_v54  ;;  %v2248_v44 = vld [vmem:[%s1992_s2 + $0x43] sm:$0xff] }
  0x6a   : > { %v493_v42 = vadd.f32 %v2222_v45, %v459_v61  ;;  %v426_v29 = vadd.f32 %v2226_v34, %v392_v2  ;;  %v726_v31 = vadd.f32 %v2075_v14, %v692_v4  ;;  %v727_v2 = vadd.f32 %v2109_v32, %v693_v36  ;;  %v2267_v36 = vld [vmem:[%s1992_s2 + $0x44] sm:$0xff] }
  0x6b   : > { %v759_v41 = vadd.f32 %v2072_v13, %v725_v0  ;;  %v593_v37 = vadd.f32 %v2103_v28, %v559_v17  ;;  %v560_v40 = vadd.f32 %v2125_v39, %v526_v18  ;;  %v660_v13 = vadd.f32 %v2112_v33, %v626_v3 }
  0x6c   : > { %v527_v0 = vadd.f32 %v2151_v63, %v493_v42  ;;  %v460_v54 = vadd.f32 %v2237_v55, %v426_v29  ;;  %v760_v61 = vadd.f32 %v2095_v24, %v726_v31  ;;  %v761_v42 = vadd.f32 %v2143_v58, %v727_v2  ;;  %v2278_v2 = vld [vmem:[%s1992_s2 + $0x45] sm:$0xff] }
  0x6d   : > { %v793_v51 = vadd.f32 %v2011_v47, %v759_v41  ;;  %v627_v4 = vadd.f32 %v2116_v35, %v593_v37  ;;  %v594_v8 = vadd.f32 %v2128_v43, %v560_v40  ;;  %v694_v18 = vadd.f32 %v2133_v49, %v660_v13 }
  0x6e   : > { %v561_v47 = vadd.f32 %v2163_v15, %v527_v0  ;;  %v494_v41 = vadd.f32 %v2248_v44, %v460_v54  ;;  %v794_v3 = vadd.f32 %v2031_v57, %v760_v61  ;;  %v795_v0 = vadd.f32 %v2058_v6, %v761_v42  ;;  %v2289_v42 = vld [vmem:[%s1992_s2 + $0x46] sm:$0xff] }
  0x6f   : > { %v827_v17 = vadd.f32 %v2014_v48, %v793_v51  ;;  %v661_v29 = vadd.f32 %v2137_v52, %v627_v4  ;;  %v628_v31 = vadd.f32 %v2148_v62, %v594_v8  ;;  %v728_v48 = vadd.f32 %v2156_v7, %v694_v18 }
  0x70   : > { %v595_v40 = vadd.f32 %v2174_v27, %v561_v47  ;;  %v528_v51 = vadd.f32 %v2267_v36, %v494_v41  ;;  %v828_v13 = vadd.f32 %v2035_v59, %v794_v3  ;;  %v829_v59 = vadd.f32 %v2065_v10, %v795_v0  ;;  %v2831_v47 = vld [vmem:[#allocation12_spill] sm:$0xff]  ;;  %v2832_v10 = vld [vmem:[#allocation13_spill] sm:$0xff] }
  0x71   : > { %v861_v37 = vadd.f32 %v2018_v50, %v827_v17  ;;  %v695_v54 = vadd.f32 %v2160_v12, %v661_v29  ;;  %v662_v61 = vadd.f32 %v2170_v25, %v628_v31  ;;  %v762_v50 = vadd.f32 %v2178_v30, %v728_v48 }
  0x72   : > { %v629_v8 = vadd.f32 %v2195_v53, %v595_v40  ;;  %v562_v17 = vadd.f32 %v2278_v2, %v528_v51  ;;  %v862_v18 = vadd.f32 %v2038_v60, %v828_v13  ;;  %v863_v60 = vadd.f32 %v2068_v11, %v829_v59  ;;  %v2300_v13 = vld [vmem:[%s1992_s2 + $0x47] sm:$0xff] }
  0x73   : > { %v895_v4 = vadd.f32 %v2028_v56, %v861_v37  ;;  %v729_v41 = vadd.f32 %v2831_v47, %v695_v54  ;;  %v696_v3 = vadd.f32 %v2191_v46, %v662_v61  ;;  %v796_v56 = vadd.f32 %v2088_v21, %v762_v50 }
  0x74   : > { %v663_v31 = vadd.f32 %v2212_v22, %v629_v8  ;;  %v596_v37 = vadd.f32 %v2289_v42, %v562_v17  ;;  %v896_v48 = vadd.f32 %v2055_v5, %v862_v18  ;;  %v897_v5 = vadd.f32 %v2085_v20, %v863_v60  ;;  %v2311_v8 = vld [vmem:[%s1992_s2 + $0x48] sm:$0xff] }
  0x75   : > { %v929_v29 = vadd.f32 %v2046_v1, %v895_v4  ;;  %v763_v40 = vadd.f32 %v2832_v10, %v729_v41  ;;  %v730_v51 = vadd.f32 %v2208_v19, %v696_v3  ;;  %v830_v1 = vadd.f32 %v2092_v23, %v796_v56  ;;  %v2322_v3 = vld [vmem:[%s1992_s2 + $0x49] sm:$0xff] }
  0x76   : > { %v697_v54 = vadd.f32 %v2226_v34, %v663_v31  ;;  %v630_v61 = vadd.f32 %v2300_v13, %v596_v37  ;;  %v930_v4 = vadd.f32 %v2079_v16, %v896_v48  ;;  %v931_v16 = vadd.f32 %v2112_v33, %v897_v5  ;;  %v2333_v37 = vld [vmem:[%s1992_s2 + $0x4a] sm:$0xff] }
  0x77   : > { %v963_v0 = vadd.f32 %v2062_v9, %v929_v29  ;;  %v797_v11 = vadd.f32 %v2121_v38, %v763_v40  ;;  %v764_v50 = vadd.f32 %v2222_v45, %v730_v51  ;;  %v864_v9 = vadd.f32 %v2103_v28, %v830_v1  ;;  %v2344_v40 = vld [vmem:[%s1992_s2 + $0x4b] sm:$0xff] }
  0x78   : > { %v731_v23 = vadd.f32 %v2237_v55, %v697_v54  ;;  %v664_v18 = vadd.f32 %v2311_v8, %v630_v61  ;;  %v964_v59 = vadd.f32 %v2099_v26, %v930_v4  ;;  %v965_v26 = vadd.f32 %v2133_v49, %v931_v16  ;;  %v2390_v16 = vld [vmem:[%s1992_s2 + $0x4f] sm:$0xff] }
  0x79   : > { %v997_v17 = vadd.f32 %v2075_v14, %v963_v0  ;;  %v831_v20 = vadd.f32 %v2125_v39, %v797_v11  ;;  %v798_v41 = vadd.f32 %v2151_v63, %v764_v50  ;;  %v898_v14 = vadd.f32 %v2116_v35, %v864_v9  ;;  %v2375_v9 = vld [vmem:[%s1992_s2 + $0x54] sm:$0xff] }
  0x7a   : > { %v765_v28 = vadd.f32 %v2248_v44, %v731_v23  ;;  %v698_v56 = vadd.f32 %v2322_v3, %v664_v18  ;;  %v998_v31 = vadd.f32 %v2109_v32, %v964_v59  ;;  %v999_v49 = vadd.f32 %v2156_v7, %v965_v26  ;;  %v2415_v26 = vld [vmem:[%s1992_s2 + $0x57] sm:$0xff] }
  0x7b   : > { %v1031_v29 = vadd.f32 %v2095_v24, %v997_v17  ;;  %v865_v33 = vadd.f32 %v2128_v43, %v831_v20  ;;  %v832_v39 = vadd.f32 %v2163_v15, %v798_v41  ;;  %v932_v24 = vadd.f32 %v2137_v52, %v898_v14  ;;  %v2372_v17 = vld [vmem:[%s1992_s2 + $0x4e] sm:$0xff]  ;;  %v2394_v41 = vld [vmem:[%s1992_s2 + $0x56] sm:$0xff] }
  0x7c   : > { %v799_v35 = vadd.f32 %v2267_v36, %v765_v28  ;;  %v732_v60 = vadd.f32 %v2333_v37, %v698_v56  ;;  %v1032_v32 = vadd.f32 %v2143_v58, %v998_v31  ;;  %v1033_v58 = vadd.f32 %v2178_v30, %v999_v49  ;;  %v2404_v14 = vld [vmem:[%s1992_s2 + $0x5d] sm:$0xff]  ;;  %v2411_v31 = vld [vmem:[%s1992_s2 + $0x50] sm:$0xff] }
  0x7d   : > { %v1065_v48 = vadd.f32 %v2031_v57, %v1031_v29  ;;  %v899_v43 = vadd.f32 %v2148_v62, %v865_v33  ;;  %v866_v15 = vadd.f32 %v2174_v27, %v832_v39  ;;  %v966_v52 = vadd.f32 %v2160_v12, %v932_v24  ;;  %v2354_v27 = vld [vmem:[%s1992_s2 + $0x4c] sm:$0xff]  ;;  %v2435_v49 = vld [vmem:[%s1992_s2 + $0x64] sm:$0xff] }
  0x7e   : > { %v833_v51 = vadd.f32 %v2278_v2, %v799_v35  ;;  %v766_v0 = vadd.f32 %v2344_v40, %v732_v60  ;;  %v1066_v1 = vadd.f32 %v2058_v6, %v1032_v32  ;;  %v2361_v6 = vld [vmem:[%s1992_s2 + $0x4d] sm:$0xff]  ;;  %v2424_v35 = vld [vmem:[%s1992_s2 + $0x5e] sm:$0xff] }
  0x7f   : > { %v1081_v57 = vmul.f32 0.04, %v1065_v48  ;;  %v933_v7 = vadd.f32 %v2170_v25, %v899_v43  ;;  %v900_v62 = vadd.f32 %v2195_v53, %v866_v15  ;;  %v1000_v12 = vadd.f32 %v2831_v47, %v966_v52  ;;  %v2420_v48 = vld [vmem:[%s1992_s2 + $0x51] sm:$0xff]  ;;  %v2438_v43 = vld [vmem:[%s1992_s2 + $0x65] sm:$0xff] }
  0x80   : > { %v867_v54 = vadd.f32 %v2289_v42, %v833_v51  ;;  %v800_v61 = vadd.f32 %v2354_v27, %v766_v0  ;;  %v291_v25 = vadd.f32 %v2267_v36, %v2278_v2  ;;  %v1082_v30 = vmul.f32 0.04, %v1066_v1  ;;  %v2444_v51 = vld [vmem:[%s1992_s2 + $0x52] sm:$0xff]  ;;  %v2451_v1 = vld [vmem:[%s1992_s2 + $0x5f] sm:$0xff] }
  0x81   : > { %1097 = vst [vmem:[%s1986_s29] sm:$0xff] %v1081_v57  ;;  %v1067_v53 = vadd.f32 %v2088_v21, %v1033_v58  ;;  %v967_v4 = vadd.f32 %v2191_v46, %v933_v7  ;;  %v934_v5 = vadd.f32 %v2212_v22, %v900_v62  ;;  %v1034_v47 = vadd.f32 %v2832_v10, %v1000_v12  ;;  %v2379_v21 = vld [vmem:[%s1992_s2 + $0x55] sm:$0xff] }
  0x82   : > { %v901_v11 = vadd.f32 %v2300_v13, %v867_v54  ;;  %v834_v50 = vadd.f32 %v2361_v6, %v800_v61  ;;  %v325_v2 = vadd.f32 %v2289_v42, %v291_v25  ;;  %1098 = vst [vmem:[%s1986_s29 + $0x8] sm:$0xff] %v1082_v30  ;;  %v292_v23 = vadd.f32 %v2354_v27, %v2361_v6  ;;  %v2461_v54 = vld [vmem:[%s1992_s2 + $0x6c] sm:$0xff] }
  0x83   : > { %v1083_v46 = vmul.f32 0.04, %v1067_v53  ;;  %v1001_v22 = vadd.f32 %v2208_v19, %v967_v4  ;;  %v968_v10 = vadd.f32 %v2226_v34, %v934_v5  ;;  %v1068_v18 = vadd.f32 %v2121_v38, %v1034_v47  ;;  %v2400_v38 = vld [vmem:[%s1992_s2 + $0x5c] sm:$0xff]  ;;  %v2465_v25 = vld [vmem:[%s1992_s2 + $0x6d] sm:$0xff] }
  0x84   : > { %v935_v59 = vadd.f32 %v2311_v8, %v901_v11  ;;  %v868_v42 = vadd.f32 %v2372_v17, %v834_v50  ;;  %v359_v20 = vadd.f32 %v2300_v13, %v325_v2  ;;  %v326_v29 = vadd.f32 %v2372_v17, %v292_v23  ;;  %v2469_v53 = vld [vmem:[%s1992_s2 + $0x53] sm:$0xff] }
  0x85   : > { %1099 = vst [vmem:[%s1986_s29 + $0x10] sm:$0xff] %v1083_v46  ;;  %v1035_v34 = vadd.f32 %v2222_v45, %v1001_v22  ;;  %v1002_v19 = vadd.f32 %v2237_v55, %v968_v10  ;;  %v293_v28 = vadd.f32 %v2375_v9, %v2379_v21  ;;  %v1084_v13 = vmul.f32 0.04, %v1068_v18  ;;  %v2482_v46 = vld [vmem:[%s1992_s2 + $0x5a] sm:$0xff]  ;;  %v2485_v22 = vld [vmem:[%s1992_s2 + $0x67] sm:$0xff] }
  0x86   : > { %v969_v56 = vadd.f32 %v2322_v3, %v935_v59  ;;  %v902_v45 = vadd.f32 %v2390_v16, %v868_v42  ;;  %v393_v55 = vadd.f32 %v2311_v8, %v359_v20  ;;  %v360_v24 = vadd.f32 %v2390_v16, %v326_v29  ;;  %v2489_v23 = vld [vmem:[%s1992_s2 + $0x6e] sm:$0xff]  ;;  %v2494_v59 = vld [vmem:[%s1992_s2 + $0x61] sm:$0xff] }
  0x87   : > { %v1069_v33 = vadd.f32 %v2151_v63, %v1035_v34  ;;  %v1036_v39 = vadd.f32 %v2248_v44, %v1002_v19  ;;  %v327_v60 = vadd.f32 %v2394_v41, %v293_v28  ;;  %1100 = vst [vmem:[%s1986_s29 + $0x18] sm:$0xff] %v1084_v13  ;;  %v2432_v44 = vld [vmem:[%s1992_s2 + $0x58] sm:$0xff]  ;;  %v294_v15 = vadd.f32 %v2400_v38, %v2404_v14 }
  0x88   : > { %v1003_v8 = vadd.f32 %v2333_v37, %v969_v56  ;;  %v936_v32 = vadd.f32 %v2411_v31, %v902_v45  ;;  %v427_v63 = vadd.f32 %v2322_v3, %v393_v55  ;;  %v2447_v3 = vld [vmem:[%s1992_s2 + $0x59] sm:$0xff]  ;;  %v394_v0 = vadd.f32 %v2411_v31, %v360_v24  ;;  %v2512_v45 = vld [vmem:[%s1992_s2 + $0x68] sm:$0xff] }
  0x89   : > { %v1085_v57 = vmul.f32 0.04, %v1069_v33  ;;  %v1070_v52 = vadd.f32 %v2267_v36, %v1036_v39  ;;  %v361_v58 = vadd.f32 %v2415_v26, %v327_v60  ;;  %v2458_v36 = vld [vmem:[%s1992_s2 + $0x66] sm:$0xff]  ;;  %v328_v61 = vadd.f32 %v2424_v35, %v294_v15  ;;  %v2502_v34 = vld [vmem:[%s1992_s2 + $0x75] sm:$0xff] }
  0x8a   : > { %v1037_v7 = vadd.f32 %v2344_v40, %v1003_v8  ;;  %v970_v62 = vadd.f32 %v2420_v48, %v936_v32  ;;  %v461_v12 = vadd.f32 %v2333_v37, %v427_v63  ;;  %v428_v4 = vadd.f32 %v2420_v48, %v394_v0  ;;  %v2473_v37 = vld [vmem:[%s1992_s2 + $0x60] sm:$0xff]  ;;  %v2516_v33 = vld [vmem:[%s1992_s2 + $0x6f] sm:$0xff] }
  0x8b   : > { %1101 = vst [vmem:[%s1986_s29 + $0x20] sm:$0xff] %v1085_v57  ;;  %v1086_v30 = vmul.f32 0.04, %v1070_v52  ;;  %v395_v5 = vadd.f32 %v2432_v44, %v361_v58  ;;  %v295_v47 = vadd.f32 %v2435_v49, %v2438_v43  ;;  %v362_v10 = vadd.f32 %v2451_v1, %v328_v61  ;;  %v2509_v56 = vld [vmem:[%s1992_s2 + $0x5b] sm:$0xff]  ;;  %v2532_v57 = vld [vmem:[%s1992_s2 + $0x63] sm:$0xff]  ;;  %v2539_v58 = vld [vmem:[%s1992_s2 + $0x70] sm:$0xff] }
  0x8c   : > { %v1071_v11 = vadd.f32 %v2354_v27, %v1037_v7  ;;  %v1004_v50 = vadd.f32 %v2444_v51, %v970_v62  ;;  %v495_v2 = vadd.f32 %v2344_v40, %v461_v12  ;;  %v462_v18 = vadd.f32 %v2444_v51, %v428_v4  ;;  %v2498_v40 = vld [vmem:[%s1992_s2 + $0x74] sm:$0xff]  ;;  %v2520_v24 = vld [vmem:[%s1992_s2 + $0x62] sm:$0xff] }
  0x8d   : > { %1102 = vst [vmem:[%s1986_s29 + $0x28] sm:$0xff] %v1086_v30  ;;  %v429_v42 = vadd.f32 %v2447_v3, %v395_v5  ;;  %v329_v20 = vadd.f32 %v2458_v36, %v295_v47  ;;  %v296_v19 = vadd.f32 %v2461_v54, %v2465_v25  ;;  %v396_v55 = vadd.f32 %v2473_v37, %v362_v10  ;;  %v2535_v52 = vld [vmem:[%s1992_s2 + $0x69] sm:$0xff]  ;;  %v2550_v30 = vld [vmem:[%s1992_s2 + $0x7c] sm:$0xff]  ;;  %v2562_v10 = vld [vmem:[%s1992_s2 + $0x71] sm:$0xff] }
  0x8e   : > { %v1087_v29 = vmul.f32 0.04, %v1071_v11  ;;  %v1038_v28 = vadd.f32 %v2469_v53, %v1004_v50  ;;  %v529_v13 = vadd.f32 %v2354_v27, %v495_v2  ;;  %v496_v39 = vadd.f32 %v2469_v53, %v462_v18  ;;  %v2525_v27 = vld [vmem:[%s1992_s2 + $0x76] sm:$0xff]  ;;  %v2558_v50 = vld [vmem:[%s1992_s2 + $0x6a] sm:$0xff] }
  0x8f   : > { %v463_v60 = vadd.f32 %v2482_v46, %v429_v42  ;;  %v363_v8 = vadd.f32 %v2485_v22, %v329_v20  ;;  %v330_v32 = vadd.f32 %v2489_v23, %v296_v19  ;;  %v430_v0 = vadd.f32 %v2494_v59, %v396_v55  ;;  %v2554_v5 = vld [vmem:[%s1992_s2 + $0x7d] sm:$0xff]  ;;  %v2578_v55 = vld [vmem:[%s1992_s2 + $0x6b] sm:$0xff] }
  0x90   : > { %1103 = vst [vmem:[%s1986_s29 + $0x30] sm:$0xff] %v1087_v29  ;;  %v1072_v63 = vadd.f32 %v2375_v9, %v1038_v28  ;;  %v563_v15 = vadd.f32 %v2361_v6, %v529_v13  ;;  %v297_v7 = vadd.f32 %v2498_v40, %v2502_v34  ;;  %v530_v62 = vadd.f32 %v2375_v9, %v496_v39  ;;  %v2547_v6 = vld [vmem:[%s1992_s2 + $0x77] sm:$0xff] }
  0x91   : > { %v497_v12 = vadd.f32 %v2509_v56, %v463_v60  ;;  %v397_v61 = vadd.f32 %v2512_v45, %v363_v8  ;;  %v364_v4 = vadd.f32 %v2516_v33, %v330_v32  ;;  %v464_v2 = vadd.f32 %v2520_v24, %v430_v0  ;;  %v2569_v29 = vld [vmem:[%s1992_s2 + $0x78] sm:$0xff] }
  0x92   : > { %v1088_v47 = vmul.f32 0.04, %v1072_v63  ;;  %v597_v11 = vadd.f32 %v2372_v17, %v563_v15  ;;  %v331_v18 = vadd.f32 %v2525_v27, %v297_v7  ;;  %v564_v42 = vadd.f32 %v2379_v21, %v530_v62  ;;  %v2573_v28 = vld [vmem:[%s1992_s2 + $0x7e] sm:$0xff]  ;;  %v2582_v60 = vld [vmem:[%s1992_s2 + $0x72] sm:$0xff] }
  0x93   : > { %v531_v20 = vadd.f32 %v2400_v38, %v497_v12  ;;  %v431_v19 = vadd.f32 %v2535_v52, %v397_v61  ;;  %v398_v17 = vadd.f32 %v2539_v58, %v364_v4  ;;  %v498_v39 = vadd.f32 %v2532_v57, %v464_v2  ;;  %2833 = vst [vmem:[#allocation12_spill] sm:$0xff] %v2582_v60  ;;  %v2595_v62 = vld [vmem:[%s1992_s2 + $0x7f] sm:$0xff]  ;;  %v2600_v4 = vld [vmem:[%s1992_s2 + $0x73] sm:$0xff] }
  0x94   : > { %1104 = vst [vmem:[%s1986_s29 + $0x38] sm:$0xff] %v1088_v47  ;;  %v631_v13 = vadd.f32 %v2390_v16, %v597_v11  ;;  %v365_v8 = vadd.f32 %v2547_v6, %v331_v18  ;;  %v298_v32 = vadd.f32 %v2550_v30, %v2554_v5  ;;  %v598_v63 = vadd.f32 %v2394_v41, %v564_v42  ;;  %v2591_v16 = vld [vmem:[%s1992_s2 + $0x79] sm:$0xff] }
  0x95   : > { %v565_v15 = vadd.f32 %v2404_v14, %v531_v20  ;;  %v465_v0 = vadd.f32 %v2558_v50, %v431_v19  ;;  %v432_v7 = vadd.f32 %v2562_v10, %v398_v17  ;;  %v532_v61 = vadd.f32 %v2435_v49, %v498_v39  ;;  %2834 = vst [vmem:[#allocation13_spill] sm:$0xff] %v2600_v4  ;;  %v2608_v20 = vld [vmem:[%s1992_s2 + $0x7a] sm:$0xff] }
  0x96   : > { %v665_v12 = vadd.f32 %v2411_v31, %v631_v13  ;;  %v399_v47 = vadd.f32 %v2569_v29, %v365_v8  ;;  %v332_v11 = vadd.f32 %v2573_v28, %v298_v32  ;;  %v632_v2 = vadd.f32 %v2415_v26, %v598_v63  ;;  %v2612_v19 = vld [vmem:[%s1992_s2 + $0x80] sm:$0xff] }
  0x97   : > { %v599_v18 = vadd.f32 %v2424_v35, %v565_v15  ;;  %v499_v42 = vadd.f32 %v2578_v55, %v465_v0  ;;  %v466_v31 = vadd.f32 %v2582_v60, %v432_v7  ;;  %v566_v13 = vadd.f32 %v2438_v43, %v532_v61  ;;  %v2622_v0 = vld [vmem:[%s1992_s2 + $0x7b] sm:$0xff] }
  0x98   : > { %v699_v17 = vadd.f32 %v2420_v48, %v665_v12  ;;  %v433_v39 = vadd.f32 %v2591_v16, %v399_v47  ;;  %v366_v8 = vadd.f32 %v2595_v62, %v332_v11  ;;  %v666_v32 = vadd.f32 %v2432_v44, %v632_v2  ;;  %v2626_v60 = vld [vmem:[%s1992_s2 + $0x81] sm:$0xff] }
  0x99   : > { %v633_v63 = vadd.f32 %v2451_v1, %v599_v18  ;;  %v533_v15 = vadd.f32 %v2461_v54, %v499_v42  ;;  %v500_v7 = vadd.f32 %v2600_v4, %v466_v31  ;;  %v600_v12 = vadd.f32 %v2458_v36, %v566_v13  ;;  %v2637_v31 = vld [vmem:[%s1992_s2 + $0x82] sm:$0xff] }
  0x9a   : > { %v733_v48 = vadd.f32 %v2444_v51, %v699_v17  ;;  %v467_v61 = vadd.f32 %v2608_v20, %v433_v39  ;;  %v400_v47 = vadd.f32 %v2612_v19, %v366_v8  ;;  %v700_v11 = vadd.f32 %v2447_v3, %v666_v32 }
  0x9b   : > { %v667_v2 = vadd.f32 %v2473_v37, %v633_v63  ;;  %v567_v18 = vadd.f32 %v2465_v25, %v533_v15  ;;  %v534_v42 = vadd.f32 %v2498_v40, %v500_v7  ;;  %v634_v51 = vadd.f32 %v2485_v22, %v600_v12  ;;  %v2648_v15 = vld [vmem:[%s1992_s2 + $0x83] sm:$0xff] }
  0x9c   : > { %v767_v4 = vadd.f32 %v2469_v53, %v733_v48  ;;  %v501_v17 = vadd.f32 %v2622_v0, %v467_v61  ;;  %v434_v13 = vadd.f32 %v2626_v60, %v400_v47  ;;  %v734_v39 = vadd.f32 %v2482_v46, %v700_v11 }
  0x9d   : > { %v701_v8 = vadd.f32 %v2494_v59, %v667_v2  ;;  %v601_v32 = vadd.f32 %v2489_v23, %v567_v18  ;;  %v568_v63 = vadd.f32 %v2502_v34, %v534_v42  ;;  %v668_v53 = vadd.f32 %v2512_v45, %v634_v51  ;;  %v2659_v18 = vld [vmem:[%s1992_s2 + $0x84] sm:$0xff] }
  0x9e   : > { %v801_v7 = vadd.f32 %v2375_v9, %v767_v4  ;;  %v535_v48 = vadd.f32 %v2550_v30, %v501_v17  ;;  %v468_v12 = vadd.f32 %v2637_v31, %v434_v13  ;;  %v768_v61 = vadd.f32 %v2509_v56, %v734_v39 }
  0x9f   : > { %v735_v47 = vadd.f32 %v2520_v24, %v701_v8  ;;  %v635_v11 = vadd.f32 %v2516_v33, %v601_v32  ;;  %v602_v2 = vadd.f32 %v2525_v27, %v568_v63  ;;  %v702_v9 = vadd.f32 %v2535_v52, %v668_v53  ;;  %v2670_v32 = vld [vmem:[%s1992_s2 + $0x85] sm:$0xff] }
  0xa0   : > { %v835_v42 = vadd.f32 %v2379_v21, %v801_v7  ;;  %v569_v4 = vadd.f32 %v2554_v5, %v535_v48  ;;  %v502_v51 = vadd.f32 %v2648_v15, %v468_v12  ;;  %v802_v17 = vadd.f32 %v2400_v38, %v768_v61 }
  0xa1   : > { %v769_v13 = vadd.f32 %v2532_v57, %v735_v47  ;;  %v669_v39 = vadd.f32 %v2539_v58, %v635_v11  ;;  %v636_v8 = vadd.f32 %v2547_v6, %v602_v2  ;;  %v736_v21 = vadd.f32 %v2558_v50, %v702_v9  ;;  %v2681_v11 = vld [vmem:[%s1992_s2 + $0x86] sm:$0xff] }
  0xa2   : > { %v869_v63 = vadd.f32 %v2394_v41, %v835_v42  ;;  %v603_v7 = vadd.f32 %v2573_v28, %v569_v4  ;;  %v536_v53 = vadd.f32 %v2659_v18, %v502_v51  ;;  %v836_v48 = vadd.f32 %v2404_v14, %v802_v17  ;;  %v2835_v51 = vld [vmem:[#allocation12_spill] sm:$0xff] }
  0xa3   : > { %v803_v12 = vadd.f32 %v2435_v49, %v769_v13  ;;  %v703_v61 = vadd.f32 %v2562_v10, %v669_v39  ;;  %v670_v47 = vadd.f32 %v2569_v29, %v636_v8  ;;  %v770_v41 = vadd.f32 %v2578_v55, %v736_v21  ;;  %v2692_v39 = vld [vmem:[%s1992_s2 + $0x87] sm:$0xff] }
  0xa4   : > { %v903_v2 = vadd.f32 %v2415_v26, %v869_v63  ;;  %v637_v42 = vadd.f32 %v2595_v62, %v603_v7  ;;  %v570_v9 = vadd.f32 %v2670_v32, %v536_v53  ;;  %v870_v4 = vadd.f32 %v2424_v35, %v836_v48 }
  0xa5   : > { %v837_v14 = vadd.f32 %v2438_v43, %v803_v12  ;;  %v737_v17 = vadd.f32 %v2835_v51, %v703_v61  ;;  %v704_v13 = vadd.f32 %v2591_v16, %v670_v47  ;;  %v804_v26 = vadd.f32 %v2461_v54, %v770_v41  ;;  %v2836_v43 = vld [vmem:[#allocation13_spill] sm:$0xff] }
  0xa6   : > { %v937_v8 = vadd.f32 %v2432_v44, %v903_v2  ;;  %v671_v63 = vadd.f32 %v2612_v19, %v637_v42  ;;  %v604_v21 = vadd.f32 %v2681_v11, %v570_v9  ;;  %v904_v7 = vadd.f32 %v2451_v1, %v870_v4  ;;  %v2703_v12 = vld [vmem:[%s1992_s2 + $0x88] sm:$0xff] }
  0xa7   : > { %v871_v35 = vadd.f32 %v2458_v36, %v837_v14  ;;  %v771_v53 = vadd.f32 %v2836_v43, %v737_v17  ;;  %v738_v48 = vadd.f32 %v2608_v20, %v704_v13  ;;  %v838_v44 = vadd.f32 %v2465_v25, %v804_v26  ;;  %v1663_v9 = vld [vmem:[%s1992_s2 + $0x89] sm:$0xff] }
  0xa8   : > { %v971_v61 = vadd.f32 %v2447_v3, %v937_v8  ;;  %v705_v47 = vadd.f32 %v2626_v60, %v671_v63  ;;  %v638_v2 = vadd.f32 %v2692_v39, %v604_v21  ;;  %v938_v41 = vadd.f32 %v2473_v37, %v904_v7  ;;  %v1680_v8 = vld [vmem:[%s1992_s2 + $0x8a] sm:$0xff] }
  0xa9   : > { %v905_v1 = vadd.f32 %v2485_v22, %v871_v35  ;;  %v805_v36 = vadd.f32 %v2498_v40, %v771_v53  ;;  %v772_v42 = vadd.f32 %v2622_v0, %v738_v48  ;;  %v872_v3 = vadd.f32 %v2489_v23, %v838_v44 }
  0xaa   : > { %v1005_v4 = vadd.f32 %v2482_v46, %v971_v61  ;;  %v739_v25 = vadd.f32 %v2637_v31, %v705_v47  ;;  %v672_v14 = vadd.f32 %v2703_v12, %v638_v2  ;;  %v972_v17 = vadd.f32 %v2494_v59, %v938_v41  ;;  %v1714_v61 = vld [vmem:[%s1992_s2 + $0x8c] sm:$0xff] }
  0xab   : > { %v939_v37 = vadd.f32 %v2512_v45, %v905_v1  ;;  %v839_v22 = vadd.f32 %v2502_v34, %v805_v36  ;;  %v806_v13 = vadd.f32 %v2550_v30, %v772_v42  ;;  %v906_v46 = vadd.f32 %v2516_v33, %v872_v3  ;;  %v1697_v34 = vld [vmem:[%s1992_s2 + $0x8b] sm:$0xff] }
  0xac   : > { %v1039_v26 = vadd.f32 %v2509_v56, %v1005_v4  ;;  %v773_v23 = vadd.f32 %v2648_v15, %v739_v25  ;;  %v706_v63 = vadd.f32 %v1663_v9, %v672_v14  ;;  %v1006_v21 = vadd.f32 %v2520_v24, %v972_v17  ;;  %v1647_v25 = vld [vmem:[%s1992_s2 + $0x90] sm:$0xff] }
  0xad   : > { %v973_v7 = vadd.f32 %v2535_v52, %v939_v37  ;;  %v873_v59 = vadd.f32 %v2525_v27, %v839_v22  ;;  %v840_v45 = vadd.f32 %v2554_v5, %v806_v13  ;;  %v940_v53 = vadd.f32 %v2539_v58, %v906_v46  ;;  %v1681_v13 = vld [vmem:[%s1992_s2 + $0x92] sm:$0xff] }
  0xae   : > { %v1073_v35 = vadd.f32 %v2400_v38, %v1039_v26  ;;  %v807_v56 = vadd.f32 %v2659_v18, %v773_v23  ;;  %v740_v33 = vadd.f32 %v1680_v8, %v706_v63  ;;  %v1040_v48 = vadd.f32 %v2532_v57, %v1006_v21  ;;  %v1715_v23 = vld [vmem:[%s1992_s2 + $0x94] sm:$0xff] }
  0xaf   : > { %v1007_v24 = vadd.f32 %v2558_v50, %v973_v7  ;;  %v907_v52 = vadd.f32 %v2547_v6, %v873_v59  ;;  %v874_v27 = vadd.f32 %v2573_v28, %v840_v45  ;;  %v974_v44 = vadd.f32 %v2562_v10, %v940_v53  ;;  %v1596_v6 = vld [vmem:[%s1992_s2 + $0x8d] sm:$0xff] }
  0xb0   : > { %v1089_v5 = vmul.f32 0.04, %v1073_v35  ;;  %v841_v38 = vadd.f32 %v2670_v32, %v807_v56  ;;  %v774_v58 = vadd.f32 %v1697_v34, %v740_v33  ;;  %v1074_v47 = vadd.f32 %v2435_v49, %v1040_v48 }
  0xb1   : > { %v1041_v2 = vadd.f32 %v2578_v55, %v1007_v24  ;;  %v941_v57 = vadd.f32 %v2569_v29, %v907_v52  ;;  %v908_v50 = vadd.f32 %v2595_v62, %v874_v27  ;;  %v1008_v28 = vadd.f32 %v2835_v51, %v974_v44  ;;  %v1613_v29 = vld [vmem:[%s1992_s2 + $0x8e] sm:$0xff] }
  0xb2   : > { %1105 = vst [vmem:[%s1986_s29 + $0x40] sm:$0xff] %v1089_v5  ;;  %v875_v10 = vadd.f32 %v2681_v11, %v841_v38  ;;  %v808_v41 = vadd.f32 %v1714_v61, %v774_v58  ;;  %v1090_v1 = vmul.f32 0.04, %v1074_v47 }
  0xb3   : > { %v1075_v32 = vadd.f32 %v2461_v54, %v1041_v2  ;;  %v975_v49 = vadd.f32 %v2591_v16, %v941_v57  ;;  %v942_v55 = vadd.f32 %v2612_v19, %v908_v50  ;;  %v1042_v62 = vadd.f32 %v2836_v43, %v1008_v28  ;;  %v1630_v54 = vld [vmem:[%s1992_s2 + $0x8f] sm:$0xff] }
  0xb4   : > { %v909_v36 = vadd.f32 %v2692_v39, %v875_v10  ;;  %v842_v42 = vadd.f32 %v1596_v6, %v808_v41  ;;  %1106 = vst [vmem:[%s1986_s29 + $0x48] sm:$0xff] %v1090_v1 }
  0xb5   : > { %v1091_v51 = vmul.f32 0.04, %v1075_v32  ;;  %v1009_v11 = vadd.f32 %v2608_v20, %v975_v49  ;;  %v976_v4 = vadd.f32 %v2626_v60, %v942_v55  ;;  %v1076_v16 = vadd.f32 %v2498_v40, %v1042_v62 }
  0xb6   : > { %v943_v19 = vadd.f32 %v2703_v12, %v909_v36  ;;  %v876_v3 = vadd.f32 %v1613_v29, %v842_v42  ;;  %v1664_v12 = vld [vmem:[%s1992_s2 + $0x91] sm:$0xff] }
  0xb7   : > { %1107 = vst [vmem:[%s1986_s29 + $0x50] sm:$0xff] %v1091_v51  ;;  %v1043_v43 = vadd.f32 %v2622_v0, %v1009_v11  ;;  %v1010_v39 = vadd.f32 %v2637_v31, %v976_v4  ;;  %v1092_v14 = vmul.f32 0.04, %v1076_v16 }
  0xb8   : > { %v977_v20 = vadd.f32 %v1663_v9, %v943_v19  ;;  %v910_v17 = vadd.f32 %v1630_v54, %v876_v3 }
  0xb9   : > { %v1077_v60 = vadd.f32 %v2550_v30, %v1043_v43  ;;  %v1044_v40 = vadd.f32 %v2648_v15, %v1010_v39  ;;  %1108 = vst [vmem:[%s1986_s29 + $0x58] sm:$0xff] %v1092_v14  ;;  %v1698_v30 = vld [vmem:[%s1992_s2 + $0x93] sm:$0xff] }
  0xba   : > { %v1011_v37 = vadd.f32 %v1680_v8, %v977_v20  ;;  %v944_v22 = vadd.f32 %v1647_v25, %v910_v17 }
  0xbb   : > { %v1093_v0 = vmul.f32 0.04, %v1077_v60  ;;  %v1078_v31 = vadd.f32 %v2659_v18, %v1044_v40 }
  0xbc   : > { %v1045_v26 = vadd.f32 %v1697_v34, %v1011_v37  ;;  %v978_v9 = vadd.f32 %v1664_v12, %v944_v22 }
  0xbd   : > { %1109 = vst [vmem:[%s1986_s29 + $0x60] sm:$0xff] %v1093_v0  ;;  %v1094_v46 = vmul.f32 0.04, %v1078_v31 }
  0xbe   : > { %v1079_v15 = vadd.f32 %v1714_v61, %v1045_v26  ;;  %v1012_v8 = vadd.f32 %v1681_v13, %v978_v9 }
  0xbf   : > { %1110 = vst [vmem:[%s1986_s29 + $0x68] sm:$0xff] %v1094_v46 }
  0xc0   : > { %v1095_v18 = vmul.f32 0.04, %v1079_v15  ;;  %v1046_v63 = vadd.f32 %v1698_v30, %v1012_v8 }
  0xc2   : > { %1111 = vst [vmem:[%s1986_s29 + $0x70] sm:$0xff] %v1095_v18  ;;  %v1080_v21 = vadd.f32 %v1715_v23, %v1046_v63 }
  0xc4   : > { %v1096_v7 = vmul.f32 0.04, %v1080_v21 }
  0xc6   : > { %1112 = vst [vmem:[%s1986_s29 + $0x78] sm:$0xff] %v1096_v7 }
  0xc7   : > { %1851 = shalt.err (!%p1848_p9)
}
  0xc8   : > { %s1913_s25 = smov 128   ;;  %s1914_s26 = smov 8  }
  0xc9   : > { %1726 = dma.vmem_to_hbm [thread:$0]  (%p1965_p4), %s1128_s12, 2048, %s1130_s13, %s1114_s9, %s1913_s25, %s1913_s25, %s1914_s26  }
  0xca PF: > { %p1738_p10 = scmp.ge.s32.totalorder %s1908_s11, 2  ;;  %s1144_s27 = sand.u32 1, %s1888_s6  }
  0xcb   : > { %s1145_s28 = scalar_lea.sflag [#allocation5], %s1144_s27 }
  0xcc   : > { %p1733_p11 = pnand %p1738_p10, %p1972_p8 }
  0xce   : > { %p1734_p12 = pneg %p1733_p11 }
  0xd0   : > { %1883 = dma.done.wait (%p1734_p12), %s1145_s28, 2048  }
  0xd1   : > { %1885 = vsyncadd (%p1734_p12), %s1145_s28, 4294965248  ;;  %s15_s11 = sadd.s32 1, %s1908_s11   ;;  %s2837_s6 = smov %s1892_s7 }
  0xd2   : > { %p12_p13 = scmp.ge.s32.totalorder %s15_s11, 4   ;;  %s2838_s7 = smov %s1896_s8 }
  0xd3   : > { %s2839_s8 = smov %s1978_s19  ;;  %s2840_s9 = smov %s1904_s10 }
  0xd4   : > { %s2841_s10 = smov %s2843_s14  ;;  %14 = sbr.rel (!%p12_p13) target bundleno = 5 (0x5), region = 116 }
  0xd9   :  { %1151 = vsyncpa [#allocation4], 1 }
  0xda   :  { %1153 = vsyncpa [#allocation4 + $0x1], 1 }
  0xdb   :  { %1154 = vsyncpa [#allocation5], 1 }
  0xdc   :  { %1156 = vsyncpa [#allocation5 + $0x1], 1 }

</bundles_post_ra>
